<compile_context>
chip_gen: v7x
topology: tpu7x:2x2x1
jax: 0.10.0
libtpu: 0.0.40
codegen_flags: <defaults>
</compile_context>

<pallas_src>
import jax
import jax.numpy as jnp
from jax.experimental import pallas as pl
from jax.experimental.pallas import tpu as pltpu

LANE = 128     # last-dim (lane) alignment
SUBLANE = 8    # second-to-last (sublane) alignment


def _round_up(n, m):
    return ((n + m - 1) // m) * m


def qnet_kernel(xt_ref, w1t_ref, b1_ref, w2t_ref, b2_ref, ot_ref):
    # fc1 (transposed): hT = relu(W1^T @ x^T + b1)
    #   w1t: (H_pad, S_pad) bf16, xt: (S_pad, TB) bf16 -> f32 accumulate on MXU
    hT = jnp.dot(w1t_ref[...], xt_ref[...], preferred_element_type=jnp.float32)
    hT = jnp.maximum(hT + b1_ref[...], 0.0)          # bias + ReLU in f32 (VPU)
    # fc2 (transposed): outT = W2^T @ hT + b2
    #   w2t: (A_pad, H_pad) bf16, hT cast to bf16 -> f32 accumulate on MXU
    oT = jnp.dot(w2t_ref[...], hT.astype(jnp.bfloat16),
                 preferred_element_type=jnp.float32)
    ot_ref[...] = (oT + b2_ref[...]).astype(ot_ref.dtype)


def _choose_batch_tiling(B, block_b):
    """Balanced, 128-aligned batch tiles; >=2 grid steps for large batches."""
    B_pad = _round_up(B, LANE)                 # minimal lane-aligned batch
    nt = pl.cdiv(B_pad, block_b)
    if nt == 1 and B_pad >= 8 * LANE:
        # Force >=2 grid steps on big batches so "parallel" grid semantics can
        # shard across v7x's two TensorCores (waste bounded to <=128 rows).
        nt = 2
    TB = _round_up(pl.cdiv(B_pad, nt), LANE)   # balanced, lane-aligned tile
    nt = pl.cdiv(B_pad, TB)
    return nt * TB, TB, nt


def qnet_forward(x, w1t_p, b1_p, w2t_p, b2_p, *, action_dim, block_b=1024):
    """x: (B, state_dim) f32.  Padded/transposed params from prepare_qnet_params."""
    B, S = x.shape
    H_pad, S_pad = w1t_p.shape
    A_pad = w2t_p.shape[0]

    B_pad, TB, nt = _choose_batch_tiling(B, block_b)

    # Pad + transpose + cast x in one wrapper copy: (S_pad, B_pad) bf16.
    # Explicit zero-padding of the S rows is required (zero * zero W1 cols),
    # padded batch columns only produce junk output columns we slice off.
    xT = jnp.pad(x.T.astype(jnp.bfloat16), ((0, S_pad - S), (0, B_pad - B)))

    grid = (nt,)

    flops = 2 * B_pad * (S_pad * H_pad + H_pad * A_pad)
    bytes_accessed = (xT.size * 2 + w1t_p.size * 2 + w2t_p.size * 2
                      + b1_p.size * 4 + b2_p.size * 4 + A_pad * B_pad * 4)
    cost = pl.CostEstimate(flops=flops, transcendentals=0,
                           bytes_accessed=bytes_accessed)

    # Per-grid-step VMEM estimate; only raise the scoped limit if we would
    # approach v5e's 16 MiB default (irrelevant at default tile sizes).
    vmem_bytes = (2 * S_pad * TB * 2            # xT tile, double-buffered, bf16
                  + 2 * A_pad * TB * 4          # out tile, double-buffered, f32
                  + H_pad * TB * (4 + 2)        # hT intermediate (f32 + bf16)
                  + (H_pad * S_pad + A_pad * H_pad) * 2   # resident weights
                  + (H_pad + A_pad) * LANE * 4)           # lane-padded biases
    cparams = {"dimension_semantics": ("parallel",)}
    if vmem_bytes > 12 * 1024 * 1024:
        cparams["vmem_limit_bytes"] = int(min(2 * vmem_bytes, 96 * 1024 * 1024))

    outT_padded = pl.pallas_call(
        qnet_kernel,
        out_shape=jax.ShapeDtypeStruct((A_pad, B_pad), jnp.float32),
        grid=grid,
        in_specs=[
            pl.BlockSpec((S_pad, TB), lambda i: (0, i)),     # xT: per-tile DMA
            pl.BlockSpec((H_pad, S_pad), lambda i: (0, 0)),  # W1^T: resident
            pl.BlockSpec((H_pad, 1), lambda i: (0, 0)),      # b1 col: resident
            pl.BlockSpec((A_pad, H_pad), lambda i: (0, 0)),  # W2^T: resident
            pl.BlockSpec((A_pad, 1), lambda i: (0, 0)),      # b2 col: resident
        ],
        # Lane-dense output: 8 sublane rows (padded actions) x TB batch lanes.
        out_specs=pl.BlockSpec((A_pad, TB), lambda i: (0, i)),
        compiler_params=pltpu.CompilerParams(**cparams),
        cost_estimate=cost,
    )(xT, w1t_p, b1_p, w2t_p, b2_p)

    # Free layout plumbing: slice real actions / batch rows, transpose tiny result.
    return outT_padded[:action_dim, :B].T


def init_qnet_params(key, state_dim, hidden_dim, action_dim):
    # Deterministic init mimicking torch.nn.Linear default:
    # U(-1/sqrt(fan_in), 1/sqrt(fan_in)); weights stored as (in, out) vs torch.
    k1, k2, k3, k4 = jax.random.split(key, 4)
    bound1 = 1.0 / jnp.sqrt(state_dim)
    bound2 = 1.0 / jnp.sqrt(hidden_dim)
    w1 = jax.random.uniform(k1, (state_dim, hidden_dim), jnp.float32, -bound1, bound1)
    b1 = jax.random.uniform(k2, (1, hidden_dim), jnp.float32, -bound1, bound1)
    w2 = jax.random.uniform(k3, (hidden_dim, action_dim), jnp.float32, -bound2, bound2)
    b2 = jax.random.uniform(k4, (1, action_dim), jnp.float32, -bound2, bound2)
    return w1, b1, w2, b2


def prepare_qnet_params(w1, b1, w2, b2):
    """Zero-pad + transpose params for the transposed-dataflow kernel.

    W1^T: (H_pad, S_pad) bf16, b1: (H_pad, 1) f32,
    W2^T: (A_pad8, H_pad) bf16, b2: (A_pad8, 1) f32.
    Action dim is padded only to 8 sublane rows (not 128 lanes) so output
    HBM writes stay small.
    """
    S, H = w1.shape
    A = w2.shape[1]
    S_pad = _round_up(S, SUBLANE)
    H_pad = _round_up(H, LANE)
    A_pad = _round_up(A, SUBLANE)
    w1t_p = jnp.zeros((H_pad, S_pad), jnp.bfloat16).at[:H, :S].set(
        w1.T.astype(jnp.bfloat16))
    b1_p = jnp.zeros((H_pad, 1), jnp.float32).at[:H, 0].set(b1.reshape(H))
    w2t_p = jnp.zeros((A_pad, H_pad), jnp.bfloat16).at[:A, :H].set(
        w2.T.astype(jnp.bfloat16))
    b2_p = jnp.zeros((A_pad, 1), jnp.float32).at[:A, 0].set(b2.reshape(A))
    return w1t_p, b1_p, w2t_p, b2_p


def _reference(x, w1, b1, w2, b2):
    return jnp.maximum(x @ w1 + b1, 0.0) @ w2 + b2


if __name__ == "__main__":
    # Small shapes consistent with a DQN Q-net (e.g. CartPole-like):
    # batch=2, state_dim=4, hidden_dim=32, action_dim=2
    B, state_dim, hidden_dim, action_dim = 2, 4, 32, 2

    key = jax.random.PRNGKey(0)
    kx, kp, kx2 = jax.random.split(key, 3)
    x = jax.random.normal(kx, (B, state_dim), jnp.float32)
    w1, b1, w2, b2 = init_qnet_params(kp, state_dim, hidden_dim, action_dim)
    w1t_p, b1_p, w2t_p, b2_p = prepare_qnet_params(w1, b1, w2, b2)

    out = qnet_forward(x, w1t_p, b1_p, w2t_p, b2_p, action_dim=action_dim)
    jax.block_until_ready(out)

    # Pure-JAX f32 reference (kernel uses bf16 inputs / f32 accumulation,
    # so tolerance accounts for bf16 rounding).
    ref = _reference(x, w1, b1, w2, b2)
    assert out.shape == (B, action_dim)
    assert jnp.allclose(out, ref, atol=5e-2, rtol=5e-2), (
        f"max abs diff {jnp.max(jnp.abs(out - ref))}")

    # Secondary check: non-multiple-of-tile batch, multi-step "parallel" grid
    # (exercises the balanced-tile path used for training-size batches).
    B2 = 1300
    x2 = jax.random.normal(kx2, (B2, state_dim), jnp.float32)
    out2 = qnet_forward(x2, w1t_p, b1_p, w2t_p, b2_p,
                        action_dim=action_dim, block_b=512)
    jax.block_until_ready(out2)
    ref2 = _reference(x2, w1, b1, w2, b2)
    assert out2.shape == (B2, action_dim)
    assert jnp.allclose(out2, ref2, atol=5e-2, rtol=5e-2), (
        f"max abs diff {jnp.max(jnp.abs(out2 - ref2))}")

    print("KERNEL_OK")
</pallas_src>

<mosaic_0001>
module attributes {stable_mosaic.version = 11 : i64} {
  func.func @qnet_kernel(%arg0: i32, %arg1: memref<8x128xbf16, #tpu.memory_space<vmem>>, %arg2: memref<128x8xbf16, #tpu.memory_space<vmem>>, %arg3: memref<128x1xf32, #tpu.memory_space<vmem>>, %arg4: memref<8x128xbf16, #tpu.memory_space<vmem>>, %arg5: memref<8x1xf32, #tpu.memory_space<vmem>>, %arg6: memref<8x128xf32, #tpu.memory_space<vmem>>) attributes {dimension_semantics = [#tpu.dimension_semantics<parallel>], iteration_bounds = array<i64: 1>, scalar_prefetch = 0 : i64, scratch_operands = 0 : i64, tpu.core_type = #tpu.core_type<tc>, window_params = [{transform_indices = @transform_0, window_bounds = array<i64: 8, 128>}, {pipeline_mode = #tpu.pipeline_mode<synchronous>, transform_indices = @transform_1, window_bounds = array<i64: 128, 8>}, {pipeline_mode = #tpu.pipeline_mode<synchronous>, transform_indices = @transform_2, window_bounds = array<i64: 128, 1>}, {pipeline_mode = #tpu.pipeline_mode<synchronous>, transform_indices = @transform_3, window_bounds = array<i64: 8, 128>}, {pipeline_mode = #tpu.pipeline_mode<synchronous>, transform_indices = @transform_4, window_bounds = array<i64: 8, 1>}, {transform_indices = @transform_5, window_bounds = array<i64: 8, 128>}]} {
    %c0 = arith.constant 0 : index
    %c0_0 = arith.constant 0 : index
    %0 = vector.load %arg2[%c0, %c0_0] : memref<128x8xbf16, #tpu.memory_space<vmem>>, vector<128x8xbf16>
    %c0_1 = arith.constant 0 : index
    %c0_2 = arith.constant 0 : index
    %1 = vector.load %arg1[%c0_1, %c0_2] : memref<8x128xbf16, #tpu.memory_space<vmem>>, vector<8x128xbf16>
    %cst = arith.constant dense<0.000000e+00> : vector<128x128xf32>
    %2 = tpu.matmul %0, %1, %cst {dimension_numbers = #tpu.dot_dimension_numbers<[1], [0], [0], [1], [0, 0, 1, 1], [], []>} : vector<128x8xbf16>, vector<8x128xbf16>, vector<128x128xf32> -> vector<128x128xf32>
    %c0_3 = arith.constant 0 : index
    %c0_4 = arith.constant 0 : index
    %3 = vector.load %arg3[%c0_3, %c0_4] : memref<128x1xf32, #tpu.memory_space<vmem>>, vector<128x1xf32>
    %4 = vector.broadcast %3 : vector<128x1xf32> to vector<128x128xf32>
    %5 = arith.addf %2, %4 : vector<128x128xf32>
    %cst_5 = arith.constant 0.000000e+00 : f32
    %6 = vector.broadcast %cst_5 : f32 to vector<128x128xf32>
    %7 = arith.maximumf %5, %6 : vector<128x128xf32>
    %c0_6 = arith.constant 0 : index
    %c0_7 = arith.constant 0 : index
    %8 = vector.load %arg4[%c0_6, %c0_7] : memref<8x128xbf16, #tpu.memory_space<vmem>>, vector<8x128xbf16>
    %9 = arith.truncf %7 : vector<128x128xf32> to vector<128x128xbf16>
    %cst_8 = arith.constant dense<0.000000e+00> : vector<8x128xf32>
    %10 = tpu.matmul %8, %9, %cst_8 {dimension_numbers = #tpu.dot_dimension_numbers<[1], [0], [0], [1], [0, 0, 1, 1], [], []>} : vector<8x128xbf16>, vector<128x128xbf16>, vector<8x128xf32> -> vector<8x128xf32>
    %c0_9 = arith.constant 0 : index
    %c0_10 = arith.constant 0 : index
    %11 = vector.load %arg5[%c0_9, %c0_10] : memref<8x1xf32, #tpu.memory_space<vmem>>, vector<8x1xf32>
    %12 = vector.broadcast %11 : vector<8x1xf32> to vector<8x128xf32>
    %13 = arith.addf %10, %12 : vector<8x128xf32>
    %c0_11 = arith.constant 0 : index
    %c0_12 = arith.constant 0 : index
    %14 = vector.load %arg6[%c0_11, %c0_12] : memref<8x128xf32, #tpu.memory_space<vmem>>, vector<8x128xf32>
    tpu.vector_store %arg6[%c0_11, %c0_12], %13 {strides = array<i32>} : memref<8x128xf32, #tpu.memory_space<vmem>>, vector<8x128xf32>,
    return
  }
  func.func @transform_0(%arg0: i32) -> (i32, i32) {
    %c0_i32 = arith.constant 0 : i32
    %c0_i32_0 = arith.constant 0 : i32
    return %c0_i32, %arg0 : i32, i32
  }
  func.func @transform_1(%arg0: i32) -> (i32, i32) {
    %c0_i32 = arith.constant 0 : i32
    %c0_i32_0 = arith.constant 0 : i32
    %c0_i32_1 = arith.constant 0 : i32
    return %c0_i32, %c0_i32_0 : i32, i32
  }
  func.func @transform_2(%arg0: i32) -> (i32, i32) {
    %c0_i32 = arith.constant 0 : i32
    %c0_i32_0 = arith.constant 0 : i32
    %c0_i32_1 = arith.constant 0 : i32
    return %c0_i32, %c0_i32_0 : i32, i32
  }
  func.func @transform_3(%arg0: i32) -> (i32, i32) {
    %c0_i32 = arith.constant 0 : i32
    %c0_i32_0 = arith.constant 0 : i32
    %c0_i32_1 = arith.constant 0 : i32
    return %c0_i32, %c0_i32_0 : i32, i32
  }
  func.func @transform_4(%arg0: i32) -> (i32, i32) {
    %c0_i32 = arith.constant 0 : i32
    %c0_i32_0 = arith.constant 0 : i32
    %c0_i32_1 = arith.constant 0 : i32
    return %c0_i32, %c0_i32_0 : i32, i32
  }
  func.func @transform_5(%arg0: i32) -> (i32, i32) {
    %c0_i32 = arith.constant 0 : i32
    %c0_i32_0 = arith.constant 0 : i32
    return %c0_i32, %arg0 : i32, i32
  }
}

</mosaic_0001>

<bundles_post_ra>
// kernel: tpu_custom_call.1
= control target key start
LH: loop header
LB: loop body
LE: loop exit
PB: predicated region body
PF: predicated region fallthrough
CT: control target
= control target key end

     0   :  { %vm200_vm0 = vcmask 1043456   ;;  %vm175_vm1 = vcmask 64512   ;;  %v498_v5 = vmov 0   ;;  %s642_s0 = inlined_call_operand.vmem [shape: bf16[8,128], index: 0, kind: input, shape index: {}]   ;;  %s643_s1 = inlined_call_operand.vmem [shape: bf16[128,8], index: 1, kind: input, shape index: {}]   ;;  %s644_s2 = inlined_call_operand.vmem [shape: f32[128,1], index: 2, kind: input, shape index: {}]   ;;  %s645_s3 = inlined_call_operand.vmem [shape: bf16[8,128], index: 3, kind: input, shape index: {}]   ;;  %s646_s4 = inlined_call_operand.vmem [shape: f32[8,1], index: 4, kind: input, shape index: {}]   ;;  %s647_s5 = inlined_call_operand.hbm [shape: f32[8,128], index: 5, kind: output, shape index: {}]  }
   0x1   :  { %v38_v0 = vld [vmem:[%s642_s0] sm:$0xf]  ;;  %v467_v3 = vld [vmem:[%s643_s1 + $0x8] sm:$0xff]   ;;  %v468_v4 = vld [vmem:[%s643_s1 + $0x10] sm:$0xff]   ;;  %464 = vset.pattern.permute.xlu0 %v498_v5  ;;  %465 = vset.pattern.permute.xlu1 %v498_v5 }
   0x2   :  { %v466_v1 = vld [vmem:[%s643_s1] sm:$0xff]   ;;  %459 = vmatprep.subr.msk.bf16.mxu0 %vm200_vm0, %v38_v0  ;;  %v202_v2 = vsel %vm200_vm0, %v38_v0, 0  ;;  %v469_v7 = vld [vmem:[%s643_s1 + $0x18] sm:$0xff]   ;;  %v41_v8 = vld [vmem:[%s644_s2 + $0x10] sm:$0xff] }
   0x3   :  { %422 = vmatpush3.bf16.msra.mxu0 %v202_v2  ;;  %423 = vmatprep.mubr.msk.bf16.mxu0 %vm175_vm1, %v466_v1  ;;  %v39_v6 = vld [vmem:[%s644_s2] sm:$0xff]  ;;  %v40_v10 = vld [vmem:[%s644_s2 + $0x8] sm:$0xff]  ;;  %v42_v11 = vld [vmem:[%s644_s2 + $0x18] sm:$0xff] }
   0x4   :  { %57 = vperm.xlu0 %464, %v39_v6   ;;  %v470_v9 = vld [vmem:[%s643_s1 + $0x20] sm:$0xff]   ;;  %67 = vperm.xlu1 %465, %v41_v8  }
   0x5   :  { %v43_v12 = vld [vmem:[%s644_s2 + $0x20] sm:$0xff] }
   0x6   :  { %424 = vmatmul.mubr.msk.bf16.vlgmr.msra.gmra.mrb[0].mxu0 %vm175_vm1, %v467_v3 }
   0x7   :  { %427 = vmatprep.mubr.msk.bf16.mxu0 %vm175_vm1, %v468_v4 }
   0x8   :  { %62 = vperm.xlu0 %464, %v40_v10   ;;  %72 = vperm.xlu1 %465, %v42_v11  }
   0xe   :  { %428 = vmatmul.mubr.msk.bf16.gmra.mrb[4].mxu0 %vm175_vm1, %v469_v7 }
   0xf   :  { %431 = vmatprep.mubr.msk.bf16.mxu0 %vm175_vm1, %v470_v9 }
  0x10   :  { %10 = vsyncpa [#allocation3], 0  ;;  %v44_v13 = vld [vmem:[%s644_s2 + $0x28] sm:$0xff]  ;;  %77 = vperm.xlu0 %464, %v43_v12   ;;  %v472_v15 = vld [vmem:[%s643_s1 + $0x30] sm:$0xff]   ;;  %v499_v28 = vmov 0.0   ;;  %vm500_vm2 = vmmov 0  }
  0x11   :  { %v471_v14 = vld [vmem:[%s643_s1 + $0x28] sm:$0xff]   ;;  %v45_v16 = vld [vmem:[%s644_s2 + $0x30] sm:$0xff]  ;;  %82 = vperm.xlu1 %465, %v44_v13   ;;  %v46_v17 = vld [vmem:[%s644_s2 + $0x38] sm:$0xff]  ;;  %439 = vmatprep.subr.bf16.mxu1 %v499_v28  ;;  %s501_s17 = smov [#allocation2]  }
  0x12   :  { %v47_v18 = vld [vmem:[%s644_s2 + $0x40] sm:$0xff]  ;;  %v48_v19 = vld [vmem:[%s644_s2 + $0x48] sm:$0xff]  ;;  %v473_v20 = vld [vmem:[%s643_s1 + $0x38] sm:$0xff]   ;;  %455 = vmatprep.mubr.msk.bf16.mxu1 %vm500_vm2, %v499_v28  ;;  %s379_s18 = sshll.u32 %s501_s17, 4  ;;  %s380_s18 = int_to_ptr.vmem [resolvable:$true] %s379_s18 }
  0x13   :  { %v49_v21 = vld [vmem:[%s644_s2 + $0x50] sm:$0xff]  ;;  %v50_v22 = vld [vmem:[%s644_s2 + $0x58] sm:$0xff]  ;;  %v51_v23 = vld [vmem:[%s644_s2 + $0x60] sm:$0xff]  ;;  %s474_s19 = scalar_lea.vmem %s380_s18, 128  ;;  %p479_p1 = scmp.lt.s32.totalorder %s380_s18, %s380_s18 }
  0x14   :  { %87 = vperm.xlu0 %464, %v45_v16   ;;  %v52_v24 = vld [vmem:[%s644_s2 + $0x68] sm:$0xff]  ;;  %v53_v25 = vld [vmem:[%s644_s2 + $0x70] sm:$0xff]  ;;  %v54_v26 = vld [vmem:[%s644_s2 + $0x78] sm:$0xff]  ;;  %p475_p0 = scmp.ne.s32.totalorder %s380_s18, %s474_s19  ;;  %p480_p2 = scmp.lt.s32.totalorder %s474_s19, %s474_s19 }
  0x15   :  { %92 = vperm.xlu1 %465, %v46_v17   ;;  %v326_v27 = vld [vmem:[%s646_s4] sm:$0xff] }
  0x16   :  { %432 = vmatmul.mubr.msk.bf16.gmra.mrb[8].mxu0 %vm175_vm1, %v471_v14  ;;  %p481_p3 = por %p480_p2, %p479_p1 }
  0x17   :  { %435 = vmatprep.mubr.msk.bf16.mxu0 %vm175_vm1, %v472_v15 }
  0x18   :  { %97 = vperm.xlu0 %464, %v47_v18   ;;  %p482_p4 = pnand %p481_p3, %p475_p0 }
  0x19   :  { %102 = vperm.xlu1 %465, %v48_v19  }
  0x1c   :  { %107 = vperm.xlu0 %464, %v49_v21  }
  0x1d   :  { %112 = vperm.xlu1 %465, %v50_v22  }
  0x1e   :  { %436 = vmatmul.mubr.msk.bf16.gmra.mrb[12].mxu0 %vm175_vm1, %v473_v20 }
  0x20   :  { %117 = vperm.xlu0 %464, %v51_v23  }
  0x21   :  { %122 = vperm.xlu1 %465, %v52_v24  }
  0x24   :  { %127 = vperm.xlu0 %464, %v53_v25  }
  0x25   :  { %132 = vperm.xlu1 %465, %v54_v26  }
  0x28   :  { %329 = vperm.xlu0 %464, %v326_v27  }
  0x83   :  { %v58_v29 = vpop.permute.xlu0 %57  ;;  %v68_v30 = vpop.permute.xlu1 %67 }
  0x87   :  { %v63_v31 = vpop.permute.xlu0 %62  ;;  %v73_v32 = vpop.permute.xlu1 %72 }
  0x8f   :  { %v78_v33 = vpop.permute.xlu0 %77 }
  0x90   :  { %v83_v34 = vpop.permute.xlu1 %82 }
  0x93   :  { %v88_v35 = vpop.permute.xlu0 %87 }
  0x94   :  { %v93_v39 = vpop.permute.xlu1 %92 }
  0x97   :  { %v98_v47 = vpop.permute.xlu0 %97 }
  0x98   :  { %v103_v51 = vpop.permute.xlu1 %102 }
  0x9b   :  { %v108_v60 = vpop.permute.xlu0 %107 }
  0x9c   :  { %v113_v0 = vpop.permute.xlu1 %112 }
  0x9f   :  { %v118_v8 = vpop.permute.xlu0 %117 }
  0xa0   :  { %v123_v13 = vpop.permute.xlu1 %122 }
  0xa3   :  { %v128_v20 = vpop.permute.xlu0 %127 }
  0xa4   :  { %v133_v25 = vpop.permute.xlu1 %132 }
  0xd9   :  { %v425_v36 = vpop.f32.mrb[0].mxu0 }
  0xda   :  { %v247_v37 = vadd.f32 %v425_v36, %v68_v30  ;;  %v238_v38 = vpop.f32.mrb[1].mxu0 }
  0xdb   :  { %v239_v40 = vadd.f32 %v238_v38, %v58_v29  ;;  %v426_v41 = vpop.f32.mrb[2].mxu0  ;;  %v317_v38 = vld [vmem:[%s645_s3] sm:$0xf] }
  0xdc   :  { %v250_v42 = vadd.f32 %v426_v41, %v73_v32  ;;  %v241_v43 = vpop.f32.mrb[3].mxu0  ;;  %v303_v45 = vmax.f32 %v247_v37, 0.0 }
  0xdd   :  { %v242_v44 = vadd.f32 %v241_v43, %v63_v31  ;;  %v301_v48 = vmax.f32 %v239_v40, 0.0 }
  0xde   :  { %v304_v46 = vmax.f32 %v250_v42, 0.0 }
  0xdf   :  { %v302_v49 = vmax.f32 %v242_v44, 0.0 }
  0xe0   :  { %v319_v50 = vpack.c.bf16 %v304_v46, %v303_v45 }
  0xe1   :  { %v429_v52 = vpop.f32.mrb[4].mxu0  ;;  %v318_v53 = vpack.c.bf16 %v302_v49, %v301_v48 }
  0xe2   :  { %v263_v54 = vadd.f32 %v429_v52, %v88_v35  ;;  %v254_v55 = vpop.f32.mrb[5].mxu0 }
  0xe3   :  { %v255_v56 = vadd.f32 %v254_v55, %v78_v33  ;;  %v430_v57 = vpop.f32.mrb[6].mxu0  ;;  %440 = vmatpush3.bf16.msra.mxu1 %v318_v53 }
  0xe4   :  { %v266_v58 = vadd.f32 %v430_v57, %v93_v39  ;;  %v257_v59 = vpop.f32.mrb[7].mxu0  ;;  %441 = vmatprep.subr.bf16.mxu1 %v499_v28  ;;  %v307_v62 = vmax.f32 %v263_v54, 0.0  ;;  %v330_v39 = vpop.permute.xlu0 %329 }
  0xe5   :  { %v258_v61 = vadd.f32 %v257_v59, %v83_v34  ;;  %v305_v1 = vmax.f32 %v255_v56, 0.0 }
  0xe6   :  { %v308_v63 = vmax.f32 %v266_v58, 0.0 }
  0xe7   :  { %v306_v2 = vmax.f32 %v258_v61, 0.0  ;;  %442 = vmatpush3.bf16.msra.mxu1 %v319_v50 }
  0xe8   :  { %v321_v3 = vpack.c.bf16 %v308_v63, %v307_v62  ;;  %443 = vmatprep.subr.bf16.mxu1 %v499_v28 }
  0xe9   :  { %v320_v4 = vpack.c.bf16 %v306_v2, %v305_v1  ;;  %v433_v5 = vpop.f32.mrb[8].mxu0 }
  0xea   :  { %v279_v6 = vadd.f32 %v433_v5, %v108_v60  ;;  %v270_v7 = vpop.f32.mrb[9].mxu0 }
  0xeb   :  { %v271_v9 = vadd.f32 %v270_v7, %v98_v47  ;;  %v434_v10 = vpop.f32.mrb[10].mxu0  ;;  %444 = vmatpush3.bf16.msra.mxu1 %v320_v4 }
  0xec   :  { %v282_v11 = vadd.f32 %v434_v10, %v113_v0  ;;  %v273_v12 = vpop.f32.mrb[11].mxu0  ;;  %445 = vmatprep.subr.bf16.mxu1 %v499_v28  ;;  %v311_v15 = vmax.f32 %v279_v6, 0.0 }
  0xed   :  { %v274_v14 = vadd.f32 %v273_v12, %v103_v51  ;;  %v309_v17 = vmax.f32 %v271_v9, 0.0 }
  0xee   :  { %v312_v16 = vmax.f32 %v282_v11, 0.0 }
  0xef   :  { %v310_v18 = vmax.f32 %v274_v14, 0.0  ;;  %446 = vmatpush3.bf16.msra.mxu1 %v321_v3 }
  0xf0   :  { %v323_v19 = vpack.c.bf16 %v312_v16, %v311_v15  ;;  %447 = vmatprep.subr.bf16.mxu1 %v499_v28 }
  0xf1   :  { %v322_v21 = vpack.c.bf16 %v310_v18, %v309_v17  ;;  %v437_v22 = vpop.f32.mrb[12].mxu0 }
  0xf2   :  { %v295_v23 = vadd.f32 %v437_v22, %v128_v20  ;;  %v286_v24 = vpop.f32.mrb[13].mxu0 }
  0xf3   :  { %v287_v26 = vadd.f32 %v286_v24, %v118_v8  ;;  %v438_v27 = vpop.f32.mrb[14].mxu0  ;;  %448 = vmatpush3.bf16.msra.mxu1 %v322_v21 }
  0xf4   :  { %v298_v29 = vadd.f32 %v438_v27, %v133_v25  ;;  %v289_v30 = vpop.f32.mrb[15].mxu0  ;;  %449 = vmatprep.subr.bf16.mxu1 %v499_v28  ;;  %v315_v32 = vmax.f32 %v295_v23, 0.0 }
  0xf5   :  { %v290_v31 = vadd.f32 %v289_v30, %v123_v13  ;;  %v313_v34 = vmax.f32 %v287_v26, 0.0 }
  0xf6   :  { %v316_v33 = vmax.f32 %v298_v29, 0.0 }
  0xf7   :  { %v314_v35 = vmax.f32 %v290_v31, 0.0  ;;  %450 = vmatpush3.bf16.msra.mxu1 %v323_v19 }
  0xf8   :  { %v325_v36 = vpack.c.bf16 %v316_v33, %v315_v32  ;;  %451 = vmatprep.subr.bf16.mxu1 %v499_v28 }
  0xf9   :  { %v324_v37 = vpack.c.bf16 %v314_v35, %v313_v34 }
  0xfb   :  { %452 = vmatpush3.bf16.msra.mxu1 %v324_v37 }
  0xfc   :  { %453 = vmatprep.subr.bf16.mxu1 %v499_v28 }
  0xff   :  { %454 = vmatpush3.bf16.msra.mxu1 %v325_v36 }
 0x102   :  { %456 = vmatmul.mubr.bf16.vlgmr.msra.gmra.mrb[0].mxu1 %v317_v38 }
 0x1d5   :  { %v366_v40 = vpop.f32.mrb[0].mxu1 }
 0x1d6   :  { %v367_v41 = vadd.f32 %v366_v40, %v330_v39  ;;  %v457_v42 = vpop.f32.mrb[1].mxu1 }
 0x1d7   :  { %v369_v43 = vpop.f32.mrb[2].mxu1 }
 0x1d8   :  { %372 = vst [vmem:[#allocation2] sm:$0xff] %v367_v41  ;;  %v458_v44 = vpop.f32.mrb[3].mxu1 }
 0x1d9   :  { %485 = shalt.err (!%p482_p4)
}
 0x1da   :  { %s486_s21 = scalar_lea.hbm %s647_s5, 128 }
 0x1db   :  { %p487_p5 = scmp.ne.s32.totalorder %s647_s5, %s486_s21  ;;  %p490_p6 = scmp.lt.u32.totalorder %s486_s21, %s647_s5 }
 0x1dd   :  { %p492_p7 = pnand %p490_p6, %p487_p5 }
 0x1df   :  { %495 = shalt.err (!%p492_p7)
}
 0x1e0   :  { %382 = dma.vmem_to_hbm [thread:$0]  %s380_s18, 128, %s647_s5, [#allocation3]  }
 0x1e1   :  { %496 = dma.done.wait [#allocation3], 128  }
 0x1e2   :  { %497 = vsyncadd [#allocation3], 4294967168 }
 0x1e3   :  { %386 = vsyncpa [#allocation3], 1 }

</bundles_post_ra>
